<compile_context>
chip_gen: v7x
topology: tpu7x:2x2x1
jax: 0.10.0
libtpu: 0.0.40
codegen_flags: <defaults>
</compile_context>

<pallas_src>
import jax
import jax.numpy as jnp
from jax.experimental import pallas as pl
from jax.experimental.pallas import tpu as pltpu

PAD = 0          # num_sequence.PAD
VOCAB = 14       # len(num_sequence): PAD/UNK/SOS/EOS + digits 0-9
EMB_DIM = 32     # config.embedding_dim
HIDDEN = 32      # config.hidden_size


def num_encoder_kernel(gi_ref, len_ref, hh_ref, out_ref, hid_ref):
    """Recurrence-only GRU kernel (PyTorch gate order r, z, n).

    gi_ref : (T*B, 3H) f32  -- x_t @ W_ih + b_ih for all timesteps (time-major).
    len_ref: (B, 1)    i32  -- valid sequence lengths.
    hh_ref : (H+B, 3H) f32  -- rows [0:H) = W_hh, rows [H:H+B) = b_hh pre-broadcast.
    out_ref: (B, T*H)  f32  -- per-step hidden states, PAD for t >= length.
    hid_ref: (B, H)    f32  -- final (frozen-at-length) hidden state.
    """
    B = len_ref.shape[0]
    H = hid_ref.shape[1]
    TB = gi_ref.shape[0]
    T = TB // B

    # ---- Hoisted loop invariants (no per-step broadcast_in_dim re-emission).
    w_hh = hh_ref[:H, :]                                   # (H, 3H)
    bhh = hh_ref[H:H + B, :]                               # (B, 3H), pre-broadcast in wrapper
    lens_b = jnp.broadcast_to(len_ref[...], (B, H))        # (B, H) int32, broadcast ONCE

    # ---- Serial GRU recurrence, fully unrolled (static slices, static indices).
    h = jnp.zeros((B, H), jnp.float32)
    for t in range(T):
        gi_t = gi_ref[t * B:(t + 1) * B, :]                               # (B, 3H)
        gh = jnp.dot(h, w_hh, preferred_element_type=jnp.float32) + bhh  # (B, 3H)
        # r and z share one 2H-wide sigmoid (single EUP push per step).
        rz = jax.nn.sigmoid(gi_t[:, :2 * H] + gh[:, :2 * H])             # (B, 2H)
        r = rz[:, :H]
        z = rz[:, H:2 * H]
        # b_hh (inside gh) must stay under the r * (...) of the n gate (PyTorch GRU).
        n = jnp.tanh(gi_t[:, 2 * H:] + r * gh[:, 2 * H:])
        h_new = (1.0 - z) * n + z * h
        valid = t < lens_b                                                # (B, H) bool
        h = jnp.where(valid, h_new, h)                                    # freeze finished rows
        # Direct static-slice store (hidden under the serial recurrence).
        out_ref[:, t * H:(t + 1) * H] = jnp.where(valid, h, jnp.float32(PAD))

    hid_ref[...] = h                                                      # single final store


def num_encoder_forward(tokens, input_length, params):
    """tokens: (B, T) int32, input_length: (B,) int32.
    Returns (out, hidden) matching PyTorch: out (B, T, H), hidden (1, B, H)."""
    emb_table, w_ih, w_hh, b_ih, b_hh = params
    B, T = tokens.shape
    H = w_hh.shape[0]

    # Fused embedding + input projection table (params-only, ~V*E*3H FLOPs).
    # Exact: each one-hot row has a single 1, and b_ih is added unconditionally,
    # so fused[tok] == emb[tok] @ W_ih + b_ih for every token (incl. PAD row).
    fused = emb_table @ w_ih + b_ih.reshape(1, 3 * H)                     # (V, 3H)

    # Gather in the wrapper (fuses with the time-major transpose); the kernel gets
    # one lane-dense (T*B, 3H) input instead of tokens + 3 projection params.
    tok_flat = tokens.astype(jnp.int32).T.reshape(T * B)                  # time-major
    gi_all = jnp.take(fused, tok_flat, axis=0)                            # (T*B, 3H)

    len_col = input_length.astype(jnp.int32).reshape(B, 1)

    # Pack the recurrence constants into ONE input (fewer DMAs): W_hh over b_hh
    # pre-broadcast to (B, 3H) so the kernel never broadcasts it.
    hh_packed = jnp.concatenate(
        [w_hh, jnp.broadcast_to(b_hh.reshape(1, 3 * H), (B, 3 * H))], axis=0)  # (H+B, 3H)

    vmem = pl.BlockSpec(memory_space=pltpu.MemorySpace.VMEM)
    out_flat, hidden = pl.pallas_call(
        num_encoder_kernel,
        out_shape=(jax.ShapeDtypeStruct((B, T * H), jnp.float32),
                   jax.ShapeDtypeStruct((B, H), jnp.float32)),
        in_specs=[vmem, vmem, vmem],
        out_specs=(vmem, vmem),
    )(gi_all, len_col, hh_packed)

    out = out_flat.reshape(B, T, H)   # free reshape -> batch_first=True layout
    hidden = hidden[None]             # (1, B, H) like nn.GRU
    # NOTE: pad_packed_sequence returns T_out = max(input_length); here T == max(len).
    return out, hidden


def ref_forward(tokens, input_length, params):
    """Pure-JAX reference implementing identical GRU + pack/pad semantics."""
    emb_table, w_ih, w_hh, b_ih, b_hh = params
    B, T = tokens.shape
    H = w_hh.shape[0]
    x = jnp.take(emb_table, tokens, axis=0)                  # (B, T, E)
    h = jnp.zeros((B, H), jnp.float32)
    outs = []
    for t in range(T):
        xt = x[:, t, :]
        gi = xt @ w_ih + b_ih
        gh = h @ w_hh + b_hh
        r = jax.nn.sigmoid(gi[:, :H] + gh[:, :H])
        z = jax.nn.sigmoid(gi[:, H:2 * H] + gh[:, H:2 * H])
        n = jnp.tanh(gi[:, 2 * H:] + r * gh[:, 2 * H:])
        h_new = (1.0 - z) * n + z * h
        valid = (t < input_length)[:, None]
        h = jnp.where(valid, h_new, h)
        outs.append(jnp.where(valid, h, jnp.float32(PAD)))
    return jnp.stack(outs, axis=1), h[None]


def init_params(key):
    k1, k2, k3, k4, k5 = jax.random.split(key, 5)
    scale = 0.1
    emb_table = jax.random.uniform(k1, (VOCAB, EMB_DIM), jnp.float32, -scale, scale)
    emb_table = emb_table.at[PAD].set(0.0)                   # padding_idx row = 0
    w_ih = jax.random.uniform(k2, (EMB_DIM, 3 * HIDDEN), jnp.float32, -scale, scale)
    w_hh = jax.random.uniform(k3, (HIDDEN, 3 * HIDDEN), jnp.float32, -scale, scale)
    b_ih = jax.random.uniform(k4, (1, 3 * HIDDEN), jnp.float32, -scale, scale)
    b_hh = jax.random.uniform(k5, (1, 3 * HIDDEN), jnp.float32, -scale, scale)
    return emb_table, w_ih, w_hh, b_ih, b_hh


if __name__ == "__main__":
    key = jax.random.PRNGKey(0)
    pkey, tkey = jax.random.split(key)
    params = init_params(pkey)

    B, T = 8, 10
    # Sorted-descending lengths (pack_padded_sequence default enforce_sorted=True).
    input_length = jnp.array([10, 9, 8, 7, 6, 5, 4, 3], dtype=jnp.int32)
    tokens = jax.random.randint(tkey, (B, T), 1, VOCAB, dtype=jnp.int32)
    pos = jnp.arange(T)[None, :]
    tokens = jnp.where(pos < input_length[:, None], tokens, PAD)   # pad tail with PAD

    out, hidden = num_encoder_forward(tokens, input_length, params)
    jax.block_until_ready((out, hidden))

    out_ref, hidden_ref = ref_forward(tokens, input_length, params)
    assert out.shape == (B, T, HIDDEN) and hidden.shape == (1, B, HIDDEN)
    assert jnp.allclose(out, out_ref, atol=1e-5, rtol=1e-5)
    assert jnp.allclose(hidden, hidden_ref, atol=1e-5, rtol=1e-5)

    print("KERNEL_OK")
</pallas_src>

<mosaic_0001>
module attributes {stable_mosaic.version = 11 : i64} {
  func.func @num_encoder_kernel(%arg0: memref<80x96xf32, #tpu.memory_space<vmem>>, %arg1: memref<8x1xi32, #tpu.memory_space<vmem>>, %arg2: memref<40x96xf32, #tpu.memory_space<vmem>>, %arg3: memref<8x320xf32, #tpu.memory_space<vmem>>, %arg4: memref<8x32xf32, #tpu.memory_space<vmem>>) attributes {dimension_semantics = [], scalar_prefetch = 0 : i64, scratch_operands = 0 : i64, tpu.core_type = #tpu.core_type<tc>} {
    %c0 = arith.constant 0 : index
    %c0_0 = arith.constant 0 : index
    %0 = vector.load %arg2[%c0, %c0_0] : memref<40x96xf32, #tpu.memory_space<vmem>>, vector<32x96xf32>
    %c32 = arith.constant 32 : index
    %c0_1 = arith.constant 0 : index
    %1 = vector.load %arg2[%c32, %c0_1] : memref<40x96xf32, #tpu.memory_space<vmem>>, vector<8x96xf32>
    %c0_2 = arith.constant 0 : index
    %c0_3 = arith.constant 0 : index
    %2 = vector.load %arg1[%c0_2, %c0_3] : memref<8x1xi32, #tpu.memory_space<vmem>>, vector<8x1xi32>
    %3 = vector.shape_cast %2 : vector<8x1xi32> to vector<8x1xi32>
    %4 = vector.broadcast %3 : vector<8x1xi32> to vector<8x32xi32>
    %cst = arith.constant 0.000000e+00 : f32
    %5 = vector.broadcast %cst : f32 to vector<8x32xf32>
    %c0_4 = arith.constant 0 : index
    %c0_5 = arith.constant 0 : index
    %6 = vector.load %arg0[%c0_4, %c0_5] : memref<80x96xf32, #tpu.memory_space<vmem>>, vector<8x96xf32>
    %cst_6 = arith.constant dense<0.000000e+00> : vector<8x96xf32>
    %7 = tpu.matmul %5, %0, %cst_6 {dimension_numbers = #tpu.dot_dimension_numbers<[1], [0], [0], [1], [0, 0, 1, 1], [], []>} : vector<8x32xf32>, vector<32x96xf32>, vector<8x96xf32> -> vector<8x96xf32>
    %8 = arith.addf %7, %1 : vector<8x96xf32>
    %9 = vector.extract_strided_slice %6 {offsets = [0, 0], sizes = [8, 64], strides = [1, 1]} : vector<8x96xf32> to vector<8x64xf32>
    %10 = vector.extract_strided_slice %8 {offsets = [0, 0], sizes = [8, 64], strides = [1, 1]} : vector<8x96xf32> to vector<8x64xf32>
    %11 = arith.addf %9, %10 : vector<8x64xf32>
    %12 = arith.negf %11 : vector<8x64xf32>
    %13 = math.exp %12 : vector<8x64xf32>
    %cst_7 = arith.constant 1.000000e+00 : f32
    %14 = vector.broadcast %cst_7 : f32 to vector<8x64xf32>
    %15 = arith.addf %14, %13 : vector<8x64xf32>
    %16 = arith.divf %14, %15 : vector<8x64xf32>
    %17 = vector.extract_strided_slice %16 {offsets = [0, 0], sizes = [8, 32], strides = [1, 1]} : vector<8x64xf32> to vector<8x32xf32>
    %18 = vector.extract_strided_slice %16 {offsets = [0, 32], sizes = [8, 32], strides = [1, 1]} : vector<8x64xf32> to vector<8x32xf32>
    %19 = vector.extract_strided_slice %6 {offsets = [0, 64], sizes = [8, 32], strides = [1, 1]} : vector<8x96xf32> to vector<8x32xf32>
    %20 = vector.extract_strided_slice %8 {offsets = [0, 64], sizes = [8, 32], strides = [1, 1]} : vector<8x96xf32> to vector<8x32xf32>
    %21 = arith.mulf %17, %20 : vector<8x32xf32>
    %22 = arith.addf %19, %21 : vector<8x32xf32>
    %23 = math.tanh %22 : vector<8x32xf32>
    %cst_8 = arith.constant 1.000000e+00 : f32
    %24 = vector.broadcast %cst_8 : f32 to vector<8x32xf32>
    %25 = arith.subf %24, %18 : vector<8x32xf32>
    %26 = arith.mulf %25, %23 : vector<8x32xf32>
    %27 = arith.mulf %18, %5 : vector<8x32xf32>
    %28 = arith.addf %26, %27 : vector<8x32xf32>
    %c0_i32 = arith.constant 0 : i32
    %29 = vector.broadcast %c0_i32 : i32 to vector<8x32xi32>
    %30 = arith.cmpi sgt, %4, %29 : vector<8x32xi32>
    %31 = arith.select %30, %28, %5 : vector<8x32xi1>, vector<8x32xf32>
    %cst_9 = arith.constant 0.000000e+00 : f32
    %32 = vector.broadcast %cst_9 : f32 to vector<8x32xf32>
    %33 = arith.select %30, %31, %32 : vector<8x32xi1>, vector<8x32xf32>
    %c0_10 = arith.constant 0 : index
    %c0_11 = arith.constant 0 : index
    %34 = vector.load %arg3[%c0_10, %c0_11] : memref<8x320xf32, #tpu.memory_space<vmem>>, vector<8x32xf32>
    tpu.vector_store %arg3[%c0_10, %c0_11], %33 {strides = array<i32>} : memref<8x320xf32, #tpu.memory_space<vmem>>, vector<8x32xf32>,
    %c8 = arith.constant 8 : index
    %c0_12 = arith.constant 0 : index
    %35 = vector.load %arg0[%c8, %c0_12] : memref<80x96xf32, #tpu.memory_space<vmem>>, vector<8x96xf32>
    %cst_13 = arith.constant dense<0.000000e+00> : vector<8x96xf32>
    %36 = tpu.matmul %31, %0, %cst_13 {dimension_numbers = #tpu.dot_dimension_numbers<[1], [0], [0], [1], [0, 0, 1, 1], [], []>} : vector<8x32xf32>, vector<32x96xf32>, vector<8x96xf32> -> vector<8x96xf32>
    %37 = arith.addf %36, %1 : vector<8x96xf32>
    %38 = vector.extract_strided_slice %35 {offsets = [0, 0], sizes = [8, 64], strides = [1, 1]} : vector<8x96xf32> to vector<8x64xf32>
    %39 = vector.extract_strided_slice %37 {offsets = [0, 0], sizes = [8, 64], strides = [1, 1]} : vector<8x96xf32> to vector<8x64xf32>
    %40 = arith.addf %38, %39 : vector<8x64xf32>
    %41 = arith.negf %40 : vector<8x64xf32>
    %42 = math.exp %41 : vector<8x64xf32>
    %cst_14 = arith.constant 1.000000e+00 : f32
    %43 = vector.broadcast %cst_14 : f32 to vector<8x64xf32>
    %44 = arith.addf %43, %42 : vector<8x64xf32>
    %45 = arith.divf %43, %44 : vector<8x64xf32>
    %46 = vector.extract_strided_slice %45 {offsets = [0, 0], sizes = [8, 32], strides = [1, 1]} : vector<8x64xf32> to vector<8x32xf32>
    %47 = vector.extract_strided_slice %45 {offsets = [0, 32], sizes = [8, 32], strides = [1, 1]} : vector<8x64xf32> to vector<8x32xf32>
    %48 = vector.extract_strided_slice %35 {offsets = [0, 64], sizes = [8, 32], strides = [1, 1]} : vector<8x96xf32> to vector<8x32xf32>
    %49 = vector.extract_strided_slice %37 {offsets = [0, 64], sizes = [8, 32], strides = [1, 1]} : vector<8x96xf32> to vector<8x32xf32>
    %50 = arith.mulf %46, %49 : vector<8x32xf32>
    %51 = arith.addf %48, %50 : vector<8x32xf32>
    %52 = math.tanh %51 : vector<8x32xf32>
    %cst_15 = arith.constant 1.000000e+00 : f32
    %53 = vector.broadcast %cst_15 : f32 to vector<8x32xf32>
    %54 = arith.subf %53, %47 : vector<8x32xf32>
    %55 = arith.mulf %54, %52 : vector<8x32xf32>
    %56 = arith.mulf %47, %31 : vector<8x32xf32>
    %57 = arith.addf %55, %56 : vector<8x32xf32>
    %c1_i32 = arith.constant 1 : i32
    %58 = vector.broadcast %c1_i32 : i32 to vector<8x32xi32>
    %59 = arith.cmpi sgt, %4, %58 : vector<8x32xi32>
    %60 = arith.select %59, %57, %31 : vector<8x32xi1>, vector<8x32xf32>
    %cst_16 = arith.constant 0.000000e+00 : f32
    %61 = vector.broadcast %cst_16 : f32 to vector<8x32xf32>
    %62 = arith.select %59, %60, %61 : vector<8x32xi1>, vector<8x32xf32>
    %c0_17 = arith.constant 0 : index
    %c32_18 = arith.constant 32 : index
    %63 = vector.load %arg3[%c0_17, %c32_18] : memref<8x320xf32, #tpu.memory_space<vmem>>, vector<8x32xf32>
    tpu.vector_store %arg3[%c0_17, %c32_18], %62 {strides = array<i32>} : memref<8x320xf32, #tpu.memory_space<vmem>>, vector<8x32xf32>,
    %c16 = arith.constant 16 : index
    %c0_19 = arith.constant 0 : index
    %64 = vector.load %arg0[%c16, %c0_19] : memref<80x96xf32, #tpu.memory_space<vmem>>, vector<8x96xf32>
    %cst_20 = arith.constant dense<0.000000e+00> : vector<8x96xf32>
    %65 = tpu.matmul %60, %0, %cst_20 {dimension_numbers = #tpu.dot_dimension_numbers<[1], [0], [0], [1], [0, 0, 1, 1], [], []>} : vector<8x32xf32>, vector<32x96xf32>, vector<8x96xf32> -> vector<8x96xf32>
    %66 = arith.addf %65, %1 : vector<8x96xf32>
    %67 = vector.extract_strided_slice %64 {offsets = [0, 0], sizes = [8, 64], strides = [1, 1]} : vector<8x96xf32> to vector<8x64xf32>
    %68 = vector.extract_strided_slice %66 {offsets = [0, 0], sizes = [8, 64], strides = [1, 1]} : vector<8x96xf32> to vector<8x64xf32>
    %69 = arith.addf %67, %68 : vector<8x64xf32>
    %70 = arith.negf %69 : vector<8x64xf32>
    %71 = math.exp %70 : vector<8x64xf32>
    %cst_21 = arith.constant 1.000000e+00 : f32
    %72 = vector.broadcast %cst_21 : f32 to vector<8x64xf32>
    %73 = arith.addf %72, %71 : vector<8x64xf32>
    %74 = arith.divf %72, %73 : vector<8x64xf32>
    %75 = vector.extract_strided_slice %74 {offsets = [0, 0], sizes = [8, 32], strides = [1, 1]} : vector<8x64xf32> to vector<8x32xf32>
    %76 = vector.extract_strided_slice %74 {offsets = [0, 32], sizes = [8, 32], strides = [1, 1]} : vector<8x64xf32> to vector<8x32xf32>
    %77 = vector.extract_strided_slice %64 {offsets = [0, 64], sizes = [8, 32], strides = [1, 1]} : vector<8x96xf32> to vector<8x32xf32>
    %78 = vector.extract_strided_slice %66 {offsets = [0, 64], sizes = [8, 32], strides = [1, 1]} : vector<8x96xf32> to vector<8x32xf32>
    %79 = arith.mulf %75, %78 : vector<8x32xf32>
    %80 = arith.addf %77, %79 : vector<8x32xf32>
    %81 = math.tanh %80 : vector<8x32xf32>
    %cst_22 = arith.constant 1.000000e+00 : f32
    %82 = vector.broadcast %cst_22 : f32 to vector<8x32xf32>
    %83 = arith.subf %82, %76 : vector<8x32xf32>
    %84 = arith.mulf %83, %81 : vector<8x32xf32>
    %85 = arith.mulf %76, %60 : vector<8x32xf32>
    %86 = arith.addf %84, %85 : vector<8x32xf32>
    %c2_i32 = arith.constant 2 : i32
    %87 = vector.broadcast %c2_i32 : i32 to vector<8x32xi32>
    %88 = arith.cmpi sgt, %4, %87 : vector<8x32xi32>
    %89 = arith.select %88, %86, %60 : vector<8x32xi1>, vector<8x32xf32>
    %cst_23 = arith.constant 0.000000e+00 : f32
    %90 = vector.broadcast %cst_23 : f32 to vector<8x32xf32>
    %91 = arith.select %88, %89, %90 : vector<8x32xi1>, vector<8x32xf32>
    %c0_24 = arith.constant 0 : index
    %c64 = arith.constant 64 : index
    %92 = vector.load %arg3[%c0_24, %c64] : memref<8x320xf32, #tpu.memory_space<vmem>>, vector<8x32xf32>
    tpu.vector_store %arg3[%c0_24, %c64], %91 {strides = array<i32>} : memref<8x320xf32, #tpu.memory_space<vmem>>, vector<8x32xf32>,
    %c24 = arith.constant 24 : index
    %c0_25 = arith.constant 0 : index
    %93 = vector.load %arg0[%c24, %c0_25] : memref<80x96xf32, #tpu.memory_space<vmem>>, vector<8x96xf32>
    %cst_26 = arith.constant dense<0.000000e+00> : vector<8x96xf32>
    %94 = tpu.matmul %89, %0, %cst_26 {dimension_numbers = #tpu.dot_dimension_numbers<[1], [0], [0], [1], [0, 0, 1, 1], [], []>} : vector<8x32xf32>, vector<32x96xf32>, vector<8x96xf32> -> vector<8x96xf32>
    %95 = arith.addf %94, %1 : vector<8x96xf32>
    %96 = vector.extract_strided_slice %93 {offsets = [0, 0], sizes = [8, 64], strides = [1, 1]} : vector<8x96xf32> to vector<8x64xf32>
    %97 = vector.extract_strided_slice %95 {offsets = [0, 0], sizes = [8, 64], strides = [1, 1]} : vector<8x96xf32> to vector<8x64xf32>
    %98 = arith.addf %96, %97 : vector<8x64xf32>
    %99 = arith.negf %98 : vector<8x64xf32>
    %100 = math.exp %99 : vector<8x64xf32>
    %cst_27 = arith.constant 1.000000e+00 : f32
    %101 = vector.broadcast %cst_27 : f32 to vector<8x64xf32>
    %102 = arith.addf %101, %100 : vector<8x64xf32>
    %103 = arith.divf %101, %102 : vector<8x64xf32>
    %104 = vector.extract_strided_slice %103 {offsets = [0, 0], sizes = [8, 32], strides = [1, 1]} : vector<8x64xf32> to vector<8x32xf32>
    %105 = vector.extract_strided_slice %103 {offsets = [0, 32], sizes = [8, 32], strides = [1, 1]} : vector<8x64xf32> to vector<8x32xf32>
    %106 = vector.extract_strided_slice %93 {offsets = [0, 64], sizes = [8, 32], strides = [1, 1]} : vector<8x96xf32> to vector<8x32xf32>
    %107 = vector.extract_strided_slice %95 {offsets = [0, 64], sizes = [8, 32], strides = [1, 1]} : vector<8x96xf32> to vector<8x32xf32>
    %108 = arith.mulf %104, %107 : vector<8x32xf32>
    %109 = arith.addf %106, %108 : vector<8x32xf32>
    %110 = math.tanh %109 : vector<8x32xf32>
    %cst_28 = arith.constant 1.000000e+00 : f32
    %111 = vector.broadcast %cst_28 : f32 to vector<8x32xf32>
    %112 = arith.subf %111, %105 : vector<8x32xf32>
    %113 = arith.mulf %112, %110 : vector<8x32xf32>
    %114 = arith.mulf %105, %89 : vector<8x32xf32>
    %115 = arith.addf %113, %114 : vector<8x32xf32>
    %c3_i32 = arith.constant 3 : i32
    %116 = vector.broadcast %c3_i32 : i32 to vector<8x32xi32>
    %117 = arith.cmpi sgt, %4, %116 : vector<8x32xi32>
    %118 = arith.select %117, %115, %89 : vector<8x32xi1>, vector<8x32xf32>
    %cst_29 = arith.constant 0.000000e+00 : f32
    %119 = vector.broadcast %cst_29 : f32 to vector<8x32xf32>
    %120 = arith.select %117, %118, %119 : vector<8x32xi1>, vector<8x32xf32>
    %c0_30 = arith.constant 0 : index
    %c96 = arith.constant 96 : index
    %121 = vector.load %arg3[%c0_30, %c96] : memref<8x320xf32, #tpu.memory_space<vmem>>, vector<8x32xf32>
    tpu.vector_store %arg3[%c0_30, %c96], %120 {strides = array<i32>} : memref<8x320xf32, #tpu.memory_space<vmem>>, vector<8x32xf32>,
    %c32_31 = arith.constant 32 : index
    %c0_32 = arith.constant 0 : index
    %122 = vector.load %arg0[%c32_31, %c0_32] : memref<80x96xf32, #tpu.memory_space<vmem>>, vector<8x96xf32>
    %cst_33 = arith.constant dense<0.000000e+00> : vector<8x96xf32>
    %123 = tpu.matmul %118, %0, %cst_33 {dimension_numbers = #tpu.dot_dimension_numbers<[1], [0], [0], [1], [0, 0, 1, 1], [], []>} : vector<8x32xf32>, vector<32x96xf32>, vector<8x96xf32> -> vector<8x96xf32>
    %124 = arith.addf %123, %1 : vector<8x96xf32>
    %125 = vector.extract_strided_slice %122 {offsets = [0, 0], sizes = [8, 64], strides = [1, 1]} : vector<8x96xf32> to vector<8x64xf32>
    %126 = vector.extract_strided_slice %124 {offsets = [0, 0], sizes = [8, 64], strides = [1, 1]} : vector<8x96xf32> to vector<8x64xf32>
    %127 = arith.addf %125, %126 : vector<8x64xf32>
    %128 = arith.negf %127 : vector<8x64xf32>
    %129 = math.exp %128 : vector<8x64xf32>
    %cst_34 = arith.constant 1.000000e+00 : f32
    %130 = vector.broadcast %cst_34 : f32 to vector<8x64xf32>
    %131 = arith.addf %130, %129 : vector<8x64xf32>
    %132 = arith.divf %130, %131 : vector<8x64xf32>
    %133 = vector.extract_strided_slice %132 {offsets = [0, 0], sizes = [8, 32], strides = [1, 1]} : vector<8x64xf32> to vector<8x32xf32>
    %134 = vector.extract_strided_slice %132 {offsets = [0, 32], sizes = [8, 32], strides = [1, 1]} : vector<8x64xf32> to vector<8x32xf32>
    %135 = vector.extract_strided_slice %122 {offsets = [0, 64], sizes = [8, 32], strides = [1, 1]} : vector<8x96xf32> to vector<8x32xf32>
    %136 = vector.extract_strided_slice %124 {offsets = [0, 64], sizes = [8, 32], strides = [1, 1]} : vector<8x96xf32> to vector<8x32xf32>
    %137 = arith.mulf %133, %136 : vector<8x32xf32>
    %138 = arith.addf %135, %137 : vector<8x32xf32>
    %139 = math.tanh %138 : vector<8x32xf32>
    %cst_35 = arith.constant 1.000000e+00 : f32
    %140 = vector.broadcast %cst_35 : f32 to vector<8x32xf32>
    %141 = arith.subf %140, %134 : vector<8x32xf32>
    %142 = arith.mulf %141, %139 : vector<8x32xf32>
    %143 = arith.mulf %134, %118 : vector<8x32xf32>
    %144 = arith.addf %142, %143 : vector<8x32xf32>
    %c4_i32 = arith.constant 4 : i32
    %145 = vector.broadcast %c4_i32 : i32 to vector<8x32xi32>
    %146 = arith.cmpi sgt, %4, %145 : vector<8x32xi32>
    %147 = arith.select %146, %144, %118 : vector<8x32xi1>, vector<8x32xf32>
    %cst_36 = arith.constant 0.000000e+00 : f32
    %148 = vector.broadcast %cst_36 : f32 to vector<8x32xf32>
    %149 = arith.select %146, %147, %148 : vector<8x32xi1>, vector<8x32xf32>
    %c0_37 = arith.constant 0 : index
    %c128 = arith.constant 128 : index
    %150 = vector.load %arg3[%c0_37, %c128] : memref<8x320xf32, #tpu.memory_space<vmem>>, vector<8x32xf32>
    tpu.vector_store %arg3[%c0_37, %c128], %149 {strides = array<i32>} : memref<8x320xf32, #tpu.memory_space<vmem>>, vector<8x32xf32>,
    %c40 = arith.constant 40 : index
    %c0_38 = arith.constant 0 : index
    %151 = vector.load %arg0[%c40, %c0_38] : memref<80x96xf32, #tpu.memory_space<vmem>>, vector<8x96xf32>
    %cst_39 = arith.constant dense<0.000000e+00> : vector<8x96xf32>
    %152 = tpu.matmul %147, %0, %cst_39 {dimension_numbers = #tpu.dot_dimension_numbers<[1], [0], [0], [1], [0, 0, 1, 1], [], []>} : vector<8x32xf32>, vector<32x96xf32>, vector<8x96xf32> -> vector<8x96xf32>
    %153 = arith.addf %152, %1 : vector<8x96xf32>
    %154 = vector.extract_strided_slice %151 {offsets = [0, 0], sizes = [8, 64], strides = [1, 1]} : vector<8x96xf32> to vector<8x64xf32>
    %155 = vector.extract_strided_slice %153 {offsets = [0, 0], sizes = [8, 64], strides = [1, 1]} : vector<8x96xf32> to vector<8x64xf32>
    %156 = arith.addf %154, %155 : vector<8x64xf32>
    %157 = arith.negf %156 : vector<8x64xf32>
    %158 = math.exp %157 : vector<8x64xf32>
    %cst_40 = arith.constant 1.000000e+00 : f32
    %159 = vector.broadcast %cst_40 : f32 to vector<8x64xf32>
    %160 = arith.addf %159, %158 : vector<8x64xf32>
    %161 = arith.divf %159, %160 : vector<8x64xf32>
    %162 = vector.extract_strided_slice %161 {offsets = [0, 0], sizes = [8, 32], strides = [1, 1]} : vector<8x64xf32> to vector<8x32xf32>
    %163 = vector.extract_strided_slice %161 {offsets = [0, 32], sizes = [8, 32], strides = [1, 1]} : vector<8x64xf32> to vector<8x32xf32>
    %164 = vector.extract_strided_slice %151 {offsets = [0, 64], sizes = [8, 32], strides = [1, 1]} : vector<8x96xf32> to vector<8x32xf32>
    %165 = vector.extract_strided_slice %153 {offsets = [0, 64], sizes = [8, 32], strides = [1, 1]} : vector<8x96xf32> to vector<8x32xf32>
    %166 = arith.mulf %162, %165 : vector<8x32xf32>
    %167 = arith.addf %164, %166 : vector<8x32xf32>
    %168 = math.tanh %167 : vector<8x32xf32>
    %cst_41 = arith.constant 1.000000e+00 : f32
    %169 = vector.broadcast %cst_41 : f32 to vector<8x32xf32>
    %170 = arith.subf %169, %163 : vector<8x32xf32>
    %171 = arith.mulf %170, %168 : vector<8x32xf32>
    %172 = arith.mulf %163, %147 : vector<8x32xf32>
    %173 = arith.addf %171, %172 : vector<8x32xf32>
    %c5_i32 = arith.constant 5 : i32
    %174 = vector.broadcast %c5_i32 : i32 to vector<8x32xi32>
    %175 = arith.cmpi sgt, %4, %174 : vector<8x32xi32>
    %176 = arith.select %175, %173, %147 : vector<8x32xi1>, vector<8x32xf32>
    %cst_42 = arith.constant 0.000000e+00 : f32
    %177 = vector.broadcast %cst_42 : f32 to vector<8x32xf32>
    %178 = arith.select %175, %176, %177 : vector<8x32xi1>, vector<8x32xf32>
    %c0_43 = arith.constant 0 : index
    %c160 = arith.constant 160 : index
    %179 = vector.load %arg3[%c0_43, %c160] : memref<8x320xf32, #tpu.memory_space<vmem>>, vector<8x32xf32>
    tpu.vector_store %arg3[%c0_43, %c160], %178 {strides = array<i32>} : memref<8x320xf32, #tpu.memory_space<vmem>>, vector<8x32xf32>,
    %c48 = arith.constant 48 : index
    %c0_44 = arith.constant 0 : index
    %180 = vector.load %arg0[%c48, %c0_44] : memref<80x96xf32, #tpu.memory_space<vmem>>, vector<8x96xf32>
    %cst_45 = arith.constant dense<0.000000e+00> : vector<8x96xf32>
    %181 = tpu.matmul %176, %0, %cst_45 {dimension_numbers = #tpu.dot_dimension_numbers<[1], [0], [0], [1], [0, 0, 1, 1], [], []>} : vector<8x32xf32>, vector<32x96xf32>, vector<8x96xf32> -> vector<8x96xf32>
    %182 = arith.addf %181, %1 : vector<8x96xf32>
    %183 = vector.extract_strided_slice %180 {offsets = [0, 0], sizes = [8, 64], strides = [1, 1]} : vector<8x96xf32> to vector<8x64xf32>
    %184 = vector.extract_strided_slice %182 {offsets = [0, 0], sizes = [8, 64], strides = [1, 1]} : vector<8x96xf32> to vector<8x64xf32>
    %185 = arith.addf %183, %184 : vector<8x64xf32>
    %186 = arith.negf %185 : vector<8x64xf32>
    %187 = math.exp %186 : vector<8x64xf32>
    %cst_46 = arith.constant 1.000000e+00 : f32
    %188 = vector.broadcast %cst_46 : f32 to vector<8x64xf32>
    %189 = arith.addf %188, %187 : vector<8x64xf32>
    %190 = arith.divf %188, %189 : vector<8x64xf32>
    %191 = vector.extract_strided_slice %190 {offsets = [0, 0], sizes = [8, 32], strides = [1, 1]} : vector<8x64xf32> to vector<8x32xf32>
    %192 = vector.extract_strided_slice %190 {offsets = [0, 32], sizes = [8, 32], strides = [1, 1]} : vector<8x64xf32> to vector<8x32xf32>
    %193 = vector.extract_strided_slice %180 {offsets = [0, 64], sizes = [8, 32], strides = [1, 1]} : vector<8x96xf32> to vector<8x32xf32>
    %194 = vector.extract_strided_slice %182 {offsets = [0, 64], sizes = [8, 32], strides = [1, 1]} : vector<8x96xf32> to vector<8x32xf32>
    %195 = arith.mulf %191, %194 : vector<8x32xf32>
    %196 = arith.addf %193, %195 : vector<8x32xf32>
    %197 = math.tanh %196 : vector<8x32xf32>
    %cst_47 = arith.constant 1.000000e+00 : f32
    %198 = vector.broadcast %cst_47 : f32 to vector<8x32xf32>
    %199 = arith.subf %198, %192 : vector<8x32xf32>
    %200 = arith.mulf %199, %197 : vector<8x32xf32>
    %201 = arith.mulf %192, %176 : vector<8x32xf32>
    %202 = arith.addf %200, %201 : vector<8x32xf32>
    %c6_i32 = arith.constant 6 : i32
    %203 = vector.broadcast %c6_i32 : i32 to vector<8x32xi32>
    %204 = arith.cmpi sgt, %4, %203 : vector<8x32xi32>
    %205 = arith.select %204, %202, %176 : vector<8x32xi1>, vector<8x32xf32>
    %cst_48 = arith.constant 0.000000e+00 : f32
    %206 = vector.broadcast %cst_48 : f32 to vector<8x32xf32>
    %207 = arith.select %204, %205, %206 : vector<8x32xi1>, vector<8x32xf32>
    %c0_49 = arith.constant 0 : index
    %c192 = arith.constant 192 : index
    %208 = vector.load %arg3[%c0_49, %c192] : memref<8x320xf32, #tpu.memory_space<vmem>>, vector<8x32xf32>
    tpu.vector_store %arg3[%c0_49, %c192], %207 {strides = array<i32>} : memref<8x320xf32, #tpu.memory_space<vmem>>, vector<8x32xf32>,
    %c56 = arith.constant 56 : index
    %c0_50 = arith.constant 0 : index
    %209 = vector.load %arg0[%c56, %c0_50] : memref<80x96xf32, #tpu.memory_space<vmem>>, vector<8x96xf32>
    %cst_51 = arith.constant dense<0.000000e+00> : vector<8x96xf32>
    %210 = tpu.matmul %205, %0, %cst_51 {dimension_numbers = #tpu.dot_dimension_numbers<[1], [0], [0], [1], [0, 0, 1, 1], [], []>} : vector<8x32xf32>, vector<32x96xf32>, vector<8x96xf32> -> vector<8x96xf32>
    %211 = arith.addf %210, %1 : vector<8x96xf32>
    %212 = vector.extract_strided_slice %209 {offsets = [0, 0], sizes = [8, 64], strides = [1, 1]} : vector<8x96xf32> to vector<8x64xf32>
    %213 = vector.extract_strided_slice %211 {offsets = [0, 0], sizes = [8, 64], strides = [1, 1]} : vector<8x96xf32> to vector<8x64xf32>
    %214 = arith.addf %212, %213 : vector<8x64xf32>
    %215 = arith.negf %214 : vector<8x64xf32>
    %216 = math.exp %215 : vector<8x64xf32>
    %cst_52 = arith.constant 1.000000e+00 : f32
    %217 = vector.broadcast %cst_52 : f32 to vector<8x64xf32>
    %218 = arith.addf %217, %216 : vector<8x64xf32>
    %219 = arith.divf %217, %218 : vector<8x64xf32>
    %220 = vector.extract_strided_slice %219 {offsets = [0, 0], sizes = [8, 32], strides = [1, 1]} : vector<8x64xf32> to vector<8x32xf32>
    %221 = vector.extract_strided_slice %219 {offsets = [0, 32], sizes = [8, 32], strides = [1, 1]} : vector<8x64xf32> to vector<8x32xf32>
    %222 = vector.extract_strided_slice %209 {offsets = [0, 64], sizes = [8, 32], strides = [1, 1]} : vector<8x96xf32> to vector<8x32xf32>
    %223 = vector.extract_strided_slice %211 {offsets = [0, 64], sizes = [8, 32], strides = [1, 1]} : vector<8x96xf32> to vector<8x32xf32>
    %224 = arith.mulf %220, %223 : vector<8x32xf32>
    %225 = arith.addf %222, %224 : vector<8x32xf32>
    %226 = math.tanh %225 : vector<8x32xf32>
    %cst_53 = arith.constant 1.000000e+00 : f32
    %227 = vector.broadcast %cst_53 : f32 to vector<8x32xf32>
    %228 = arith.subf %227, %221 : vector<8x32xf32>
    %229 = arith.mulf %228, %226 : vector<8x32xf32>
    %230 = arith.mulf %221, %205 : vector<8x32xf32>
    %231 = arith.addf %229, %230 : vector<8x32xf32>
    %c7_i32 = arith.constant 7 : i32
    %232 = vector.broadcast %c7_i32 : i32 to vector<8x32xi32>
    %233 = arith.cmpi sgt, %4, %232 : vector<8x32xi32>
    %234 = arith.select %233, %231, %205 : vector<8x32xi1>, vector<8x32xf32>
    %cst_54 = arith.constant 0.000000e+00 : f32
    %235 = vector.broadcast %cst_54 : f32 to vector<8x32xf32>
    %236 = arith.select %233, %234, %235 : vector<8x32xi1>, vector<8x32xf32>
    %c0_55 = arith.constant 0 : index
    %c224 = arith.constant 224 : index
    %237 = vector.load %arg3[%c0_55, %c224] : memref<8x320xf32, #tpu.memory_space<vmem>>, vector<8x32xf32>
    tpu.vector_store %arg3[%c0_55, %c224], %236 {strides = array<i32>} : memref<8x320xf32, #tpu.memory_space<vmem>>, vector<8x32xf32>,
    %c64_56 = arith.constant 64 : index
    %c0_57 = arith.constant 0 : index
    %238 = vector.load %arg0[%c64_56, %c0_57] : memref<80x96xf32, #tpu.memory_space<vmem>>, vector<8x96xf32>
    %cst_58 = arith.constant dense<0.000000e+00> : vector<8x96xf32>
    %239 = tpu.matmul %234, %0, %cst_58 {dimension_numbers = #tpu.dot_dimension_numbers<[1], [0], [0], [1], [0, 0, 1, 1], [], []>} : vector<8x32xf32>, vector<32x96xf32>, vector<8x96xf32> -> vector<8x96xf32>
    %240 = arith.addf %239, %1 : vector<8x96xf32>
    %241 = vector.extract_strided_slice %238 {offsets = [0, 0], sizes = [8, 64], strides = [1, 1]} : vector<8x96xf32> to vector<8x64xf32>
    %242 = vector.extract_strided_slice %240 {offsets = [0, 0], sizes = [8, 64], strides = [1, 1]} : vector<8x96xf32> to vector<8x64xf32>
    %243 = arith.addf %241, %242 : vector<8x64xf32>
    %244 = arith.negf %243 : vector<8x64xf32>
    %245 = math.exp %244 : vector<8x64xf32>
    %cst_59 = arith.constant 1.000000e+00 : f32
    %246 = vector.broadcast %cst_59 : f32 to vector<8x64xf32>
    %247 = arith.addf %246, %245 : vector<8x64xf32>
    %248 = arith.divf %246, %247 : vector<8x64xf32>
    %249 = vector.extract_strided_slice %248 {offsets = [0, 0], sizes = [8, 32], strides = [1, 1]} : vector<8x64xf32> to vector<8x32xf32>
    %250 = vector.extract_strided_slice %248 {offsets = [0, 32], sizes = [8, 32], strides = [1, 1]} : vector<8x64xf32> to vector<8x32xf32>
    %251 = vector.extract_strided_slice %238 {offsets = [0, 64], sizes = [8, 32], strides = [1, 1]} : vector<8x96xf32> to vector<8x32xf32>
    %252 = vector.extract_strided_slice %240 {offsets = [0, 64], sizes = [8, 32], strides = [1, 1]} : vector<8x96xf32> to vector<8x32xf32>
    %253 = arith.mulf %249, %252 : vector<8x32xf32>
    %254 = arith.addf %251, %253 : vector<8x32xf32>
    %255 = math.tanh %254 : vector<8x32xf32>
    %cst_60 = arith.constant 1.000000e+00 : f32
    %256 = vector.broadcast %cst_60 : f32 to vector<8x32xf32>
    %257 = arith.subf %256, %250 : vector<8x32xf32>
    %258 = arith.mulf %257, %255 : vector<8x32xf32>
    %259 = arith.mulf %250, %234 : vector<8x32xf32>
    %260 = arith.addf %258, %259 : vector<8x32xf32>
    %c8_i32 = arith.constant 8 : i32
    %261 = vector.broadcast %c8_i32 : i32 to vector<8x32xi32>
    %262 = arith.cmpi sgt, %4, %261 : vector<8x32xi32>
    %263 = arith.select %262, %260, %234 : vector<8x32xi1>, vector<8x32xf32>
    %cst_61 = arith.constant 0.000000e+00 : f32
    %264 = vector.broadcast %cst_61 : f32 to vector<8x32xf32>
    %265 = arith.select %262, %263, %264 : vector<8x32xi1>, vector<8x32xf32>
    %c0_62 = arith.constant 0 : index
    %c256 = arith.constant 256 : index
    %266 = vector.load %arg3[%c0_62, %c256] : memref<8x320xf32, #tpu.memory_space<vmem>>, vector<8x32xf32>
    tpu.vector_store %arg3[%c0_62, %c256], %265 {strides = array<i32>} : memref<8x320xf32, #tpu.memory_space<vmem>>, vector<8x32xf32>,
    %c72 = arith.constant 72 : index
    %c0_63 = arith.constant 0 : index
    %267 = vector.load %arg0[%c72, %c0_63] : memref<80x96xf32, #tpu.memory_space<vmem>>, vector<8x96xf32>
    %cst_64 = arith.constant dense<0.000000e+00> : vector<8x96xf32>
    %268 = tpu.matmul %263, %0, %cst_64 {dimension_numbers = #tpu.dot_dimension_numbers<[1], [0], [0], [1], [0, 0, 1, 1], [], []>} : vector<8x32xf32>, vector<32x96xf32>, vector<8x96xf32> -> vector<8x96xf32>
    %269 = arith.addf %268, %1 : vector<8x96xf32>
    %270 = vector.extract_strided_slice %267 {offsets = [0, 0], sizes = [8, 64], strides = [1, 1]} : vector<8x96xf32> to vector<8x64xf32>
    %271 = vector.extract_strided_slice %269 {offsets = [0, 0], sizes = [8, 64], strides = [1, 1]} : vector<8x96xf32> to vector<8x64xf32>
    %272 = arith.addf %270, %271 : vector<8x64xf32>
    %273 = arith.negf %272 : vector<8x64xf32>
    %274 = math.exp %273 : vector<8x64xf32>
    %cst_65 = arith.constant 1.000000e+00 : f32
    %275 = vector.broadcast %cst_65 : f32 to vector<8x64xf32>
    %276 = arith.addf %275, %274 : vector<8x64xf32>
    %277 = arith.divf %275, %276 : vector<8x64xf32>
    %278 = vector.extract_strided_slice %277 {offsets = [0, 0], sizes = [8, 32], strides = [1, 1]} : vector<8x64xf32> to vector<8x32xf32>
    %279 = vector.extract_strided_slice %277 {offsets = [0, 32], sizes = [8, 32], strides = [1, 1]} : vector<8x64xf32> to vector<8x32xf32>
    %280 = vector.extract_strided_slice %267 {offsets = [0, 64], sizes = [8, 32], strides = [1, 1]} : vector<8x96xf32> to vector<8x32xf32>
    %281 = vector.extract_strided_slice %269 {offsets = [0, 64], sizes = [8, 32], strides = [1, 1]} : vector<8x96xf32> to vector<8x32xf32>
    %282 = arith.mulf %278, %281 : vector<8x32xf32>
    %283 = arith.addf %280, %282 : vector<8x32xf32>
    %284 = math.tanh %283 : vector<8x32xf32>
    %cst_66 = arith.constant 1.000000e+00 : f32
    %285 = vector.broadcast %cst_66 : f32 to vector<8x32xf32>
    %286 = arith.subf %285, %279 : vector<8x32xf32>
    %287 = arith.mulf %286, %284 : vector<8x32xf32>
    %288 = arith.mulf %279, %263 : vector<8x32xf32>
    %289 = arith.addf %287, %288 : vector<8x32xf32>
    %c9_i32 = arith.constant 9 : i32
    %290 = vector.broadcast %c9_i32 : i32 to vector<8x32xi32>
    %291 = arith.cmpi sgt, %4, %290 : vector<8x32xi32>
    %292 = arith.select %291, %289, %263 : vector<8x32xi1>, vector<8x32xf32>
    %cst_67 = arith.constant 0.000000e+00 : f32
    %293 = vector.broadcast %cst_67 : f32 to vector<8x32xf32>
    %294 = arith.select %291, %292, %293 : vector<8x32xi1>, vector<8x32xf32>
    %c0_68 = arith.constant 0 : index
    %c288 = arith.constant 288 : index
    %295 = vector.load %arg3[%c0_68, %c288] : memref<8x320xf32, #tpu.memory_space<vmem>>, vector<8x32xf32>
    tpu.vector_store %arg3[%c0_68, %c288], %294 {strides = array<i32>} : memref<8x320xf32, #tpu.memory_space<vmem>>, vector<8x32xf32>,
    %c0_69 = arith.constant 0 : index
    %c0_70 = arith.constant 0 : index
    %296 = vector.load %arg4[%c0_69, %c0_70] : memref<8x32xf32, #tpu.memory_space<vmem>>, vector<8x32xf32>
    tpu.vector_store %arg4[%c0_69, %c0_70], %292 {strides = array<i32>} : memref<8x32xf32, #tpu.memory_space<vmem>>, vector<8x32xf32>,
    return
  }
}

</mosaic_0001>

<bundles_post_ra>
// kernel: tpu_custom_call.1
= control target key start
LH: loop header
LB: loop body
LE: loop exit
PB: predicated region body
PF: predicated region fallthrough
CT: control target
= control target key end

     0   :  { %10 = vsyncpa [#allocation3], 0  ;;  %s1846_s0 = inlined_call_operand.hbm [shape: f32[80,96], index: 0, kind: input, shape index: {}]   ;;  %s1847_s1 = inlined_call_operand.vmem [shape: s32[8,1], index: 1, kind: input, shape index: {}]   ;;  %s1848_s2 = inlined_call_operand.hbm [shape: f32[40,96], index: 2, kind: input, shape index: {}]   ;;  %s1849_s3 = inlined_call_operand.hbm [shape: f32[8,320], index: 3, kind: output, shape index: {0}]   ;;  %s1850_s4 = inlined_call_operand.hbm [shape: f32[8,32], index: 4, kind: output, shape index: {1}]  }
   0x1   :  { %11 = vsyncpa [#allocation6], 0 }
   0x2   :  { %12 = vsyncpa [#allocation4], 0 }
   0x3   :  { %13 = vsyncpa [#allocation9], 0  ;;  %s1586_s15 = smov [#allocation2]   ;;  %s1490_s19 = scalar_lea.hbm %s1846_s0, 1280 }
   0x4   :  { %s19_s16 = sshll.u32 %s1586_s15, 4  ;;  %p1491_p0 = scmp.ne.s32.totalorder %s1846_s0, %s1490_s19  ;;  %s20_s16 = int_to_ptr.vmem [resolvable:$true] %s19_s16 }
   0x5   :  { %p1494_p1 = scmp.lt.u32.totalorder %s1490_s19, %s1846_s0 }
   0x7   :  { %p1496_p2 = pnand %p1494_p1, %p1491_p0 }
   0x9   :  { %1499 = shalt.err (!%p1496_p2)
}
   0xa   :  { %s1500_s24 = scalar_lea.vmem %s20_s16, 1280  ;;  %p1505_p4 = scmp.lt.s32.totalorder %s20_s16, %s20_s16 }
   0xb   :  { %p1501_p3 = scmp.ne.s32.totalorder %s20_s16, %s1500_s24  ;;  %p1506_p5 = scmp.lt.s32.totalorder %s1500_s24, %s1500_s24 }
   0xd   :  { %p1507_p6 = por %p1506_p5, %p1505_p4 }
   0xf   :  { %p1508_p7 = pnand %p1507_p6, %p1501_p3 }
  0x11   :  { %1511 = shalt.err (!%p1508_p7)
}
  0x12   :  { %s1587_s25 = smov 128   ;;  %s1588_s26 = smov 8  }
  0x13   :  { %25 = dma.hbm_to_vmem [thread:$0]  %s1846_s0, 1280, %s20_s16, [#allocation3], %s1587_s25, %s1587_s25, %s1588_s26  }
  0x14   :  { %s1589_s29 = smov [#allocation5]   ;;  %s1512_s7 = scalar_lea.hbm %s1848_s2, 640 }
  0x15   :  { %s33_s30 = sshll.u32 %s1589_s29, 4  ;;  %p1513_p8 = scmp.ne.s32.totalorder %s1848_s2, %s1512_s7  ;;  %s34_s30 = int_to_ptr.vmem [resolvable:$true] %s33_s30 }
  0x16   :  { %p1516_p9 = scmp.lt.u32.totalorder %s1512_s7, %s1848_s2 }
  0x18   :  { %p1518_p10 = pnand %p1516_p9, %p1513_p8 }
  0x1a   :  { %1521 = shalt.err (!%p1518_p10)
}
  0x1b   :  { %s1522_s12 = scalar_lea.vmem %s34_s30, 640  ;;  %p1527_p12 = scmp.lt.s32.totalorder %s34_s30, %s34_s30 }
  0x1c   :  { %p1523_p11 = scmp.ne.s32.totalorder %s34_s30, %s1522_s12  ;;  %p1528_p13 = scmp.lt.s32.totalorder %s1522_s12, %s1522_s12 }
  0x1e   :  { %p1529_p0 = por %p1528_p13, %p1527_p12 }
  0x20   :  { %p1530_p1 = pnand %p1529_p0, %p1523_p11 }
  0x22   :  { %1533 = shalt.err (!%p1530_p1)
}
  0x23   :  { %39 = dma.hbm_to_vmem [thread:$0]  %s1848_s2, 640, %s34_s30, [#allocation6], %s1587_s25, %s1587_s25, %s1588_s26  }
  0x24   :  { %1578 = dma.done.wait [#allocation3], 1280  }
  0x25   :  { %1579 = vsyncadd [#allocation3], 4294966016 }
  0x26   :  { %1580 = dma.done.wait [#allocation6], 640  }
  0x27   :  { %1581 = vsyncadd [#allocation6], 4294966656  ;;  %v1590_v0 = vmov 0.0|0.0   ;;  %vm1591_vm0 = vmmov 0   ;;  %v1592_v1 = vmov 0.0   ;;  %v46_v2 = vld [vmem:[#allocation5] sm:$0xff] }
  0x28   :  { %1355 = vmatprep.subr.bf16.mxu0 %v1590_v0  ;;  %1253 = vmatprep.mubr.msk.f32.mxu0 %vm1591_vm0, %v1592_v1  ;;  %v47_v3 = vld [vmem:[#allocation5 + $0x8] sm:$0xff]  ;;  %v48_v4 = vld [vmem:[#allocation5 + $0x10] sm:$0xff]  ;;  %v49_v6 = vld [vmem:[#allocation5 + $0x18] sm:$0xff]  ;;  %v1593_v9 = vmov 0   ;;  %s1594_s15 = smov 64   ;;  %vm56_vm2 = vcmask 261120  }
  0x29   :  { %1361 = vmatprep.subr.bf16.mxu1 %v1590_v0  ;;  %1264 = vmatprep.mubr.msk.f32.mxu1 %vm1591_vm0, %v1592_v1  ;;  %v1654_v5 = vpack.c.bf16 %v47_v3, %v46_v2  ;;  %v1657_v7 = vpack.c.bf16 %v49_v6, %v48_v4  ;;  %v51_v8 = vld [vmem:[%s1847_s1] sm:$0xff]  ;;  %v1676_v10 = vld [vmem:[#allocation5 + $0x20] sm:$0xff]  ;;  %s1595_s1 = smov 96   ;;  %v163_v36 = vld [vmem:[#allocation2 + $0x8] sm:$0xff]  ;;  %vm265_vm3 = vcmask 523520   ;;  %s1596_s16 = smov 32  }
  0x2a   :  { %1428 = vset.pattern.permute.xlu1 %v1593_v9  ;;  %1429 = vset.pattern.permute.xlu0 %v1593_v9  ;;  %v55_v14 = vld [vmem:[#allocation2] sm:$0xff]  ;;  %v267_v58 = vld [vmem:[#allocation2 + $0x10] sm:$0xff]  ;;  %vm376_vm12 = vcmask 785920   ;;  %vm487_vm13 = vcmask 1048320   ;;  %s1597_s17 = smov [#allocation7]  }
  0x2b   :  { %1357 = vmatpush3.bf16.msra.mxu0 %v1654_v5  ;;  %1363 = vmatpush3.bf16.msra.mxu1 %v1654_v5  ;;  %s1152_s18 = sshll.u32 %s1597_s17, 4  ;;  %s1153_s18 = int_to_ptr.vmem [resolvable:$true] %s1152_s18 }
  0x2c   :  { %1358 = vmatprep.subr.bf16.mxu0 %v1590_v0  ;;  %1364 = vmatprep.subr.bf16.mxu1 %v1590_v0  ;;  %s1534_s19 = scalar_lea.vmem %s1153_s18, 384  ;;  %p1539_p3 = scmp.lt.s32.totalorder %s1153_s18, %s1153_s18 }
  0x2d   :  { %53 = vperm.xlu1 %1428, %v51_v8   ;;  %p1535_p2 = scmp.ne.s32.totalorder %s1153_s18, %s1534_s19  ;;  %p1540_p4 = scmp.lt.s32.totalorder %s1534_s19, %s1534_s19 }
  0x2f   :  { %1360 = vmatpush3.bf16.msra.mxu0 %v1657_v7  ;;  %1366 = vmatpush3.bf16.msra.mxu1 %v1657_v7  ;;  %p1541_p5 = por %p1540_p4, %p1539_p3 }
  0x30   :  { %1367 = vmatprep.subr.bf16.mxu0 %v1590_v0  ;;  %1373 = vmatprep.subr.bf16.mxu1 %v1590_v0 }
  0x31   :  { %p1542_p6 = pnand %p1541_p5, %p1535_p2 }
  0x32   :  { %1254 = vmatmul.mubr.f32.vlgmr.msra.gmra.mrb[0].mxu0 %v1592_v1 }
  0x33   :  { %1369 = vmatpush3.bf16.msra.mxu0 %v1654_v5  ;;  %1275 = vmatprep.mubr.msk.f32.mxu0 %vm1591_vm0, %v1592_v1 }
  0x34   :  { %1370 = vmatprep.subr.bf16.mxu0 %v1590_v0 }
  0x37   :  { %1372 = vmatpush3.bf16.msra.mxu0 %v1657_v7 }
  0x38   :  { %1379 = vmatprep.subr.bf16.mxu0 %v1590_v0 }
  0xac   :  { %v1682_v25 = vpop.permute.xlu1 %53 }
  0xad   :  { %vm156_vm1 = vcmp.gt.s32.totalorder %v1682_v25, 0  ;;  %vm262_vm4 = vcmp.gt.s32.totalorder %v1682_v25, 1  ;;  %vm369_vm5 = vcmp.gt.s32.totalorder %v1682_v25, 2  ;;  %vm480_vm6 = vcmp.gt.s32.totalorder %v1682_v25, 3 }
  0xae   :  { %vm591_vm7 = vcmp.gt.s32.totalorder %v1682_v25, 4  ;;  %vm701_vm8 = vcmp.gt.s32.totalorder %v1682_v25, 5  ;;  %vm807_vm9 = vcmp.gt.s32.totalorder %v1682_v25, 6  ;;  %vm917_vm10 = vcmp.gt.s32.totalorder %v1682_v25, 7 }
  0xaf   :  { %vm1027_vm11 = vcmp.gt.s32.totalorder %v1682_v25, 8  ;;  %vm1137_vm14 = vcmp.gt.s32.totalorder %v1682_v25, 9 }
 0x105   :  { %v126_v11 = vpop.f32.mrb[0].mxu0 }
 0x106   :  { %v127_v12 = vadd.f32 %v126_v11, %v1676_v10  ;;  %v1255_v13 = vpop.f32.mrb[1].mxu0 }
 0x108   :  { %138 = vrot.lane.b32.xlu0 %v127_v12, %s1594_s15  ;;  %v130_v15 = vadd.f32 %v127_v12, %v55_v14 }
 0x10a   :  { %v1176_v16 = vmul.f32 -1.442695, %v130_v15 }
 0x10c   :  { %1430 = vpow2.f32 %v1176_v16 }
 0x116   :  { %v1431_v17 = vpop.eup %1430 }
 0x117   :  { %v134_v18 = vadd.f32 1.0, %v1431_v17 }
 0x119   :  { %1432 = vrcp.f32 %v134_v18 }
 0x123   :  { %v1433_v19 = vpop.eup %1432 }
 0x124   :  { %v148_v26 = vsub.f32 1.0, %v1433_v19  ;;  %v154_v28 = vmul.f32 0.0, %v1433_v19 }
 0x17a   :  { %v139_v20 = vpop.permute.xlu0 %138 }
 0x17b   :  { %v141_v21 = vmul.f32 %v1433_v19, %v139_v20 }
 0x17d   :  { %143 = vrot.lane.b32.xlu0 %v141_v21, %s1594_s15  ;;  %v378_v21 = vld [vmem:[#allocation2 + $0x18] sm:$0xff] }
 0x1ef   :  { %v144_v22 = vpop.permute.xlu0 %143 }
 0x1f0   :  { %v146_v23 = vadd.f32 %v144_v22, %v55_v14 }
 0x1f2   :  { %1434 = vtanh.f32 %v146_v23 }
 0x1fc   :  { %v1435_v24 = vpop.eup %1434 }
 0x1fd   :  { %150 = vrot.lane.b32.xlu1 %v1435_v24, %s1595_s1 }
 0x26f   :  { %v151_v27 = vpop.permute.xlu1 %150 }
 0x270   :  { %v153_v29 = vmul.f32 %v151_v27, %v148_v26 }
 0x272   :  { %v155_v30 = vadd.f32 %v154_v28, %v153_v29 }
 0x274   :  { %v157_v31 = vsel %vm156_vm1, %v155_v30, 0.0 }
 0x275   :  { %159 = vrot.lane.b32.xlu0 %v157_v31, %s1595_s1 }
 0x2e7   :  { %v160_v32 = vpop.permute.xlu0 %159 }
 0x2e8   :  { %162 = vst.msk [vmem:[#allocation7] sm:$0xff] %vm56_vm2, %v160_v32  ;;  %1265 = vmatmul.mubr.msk.f32.vlgmr.msra.gmra.mrb[0].mxu1 %vm56_vm2, %v160_v32 }
 0x2e9   :  { %1375 = vmatpush3.bf16.msra.mxu1 %v1654_v5  ;;  %1286 = vmatprep.mubr.msk.f32.mxu1 %vm1591_vm0, %v1592_v1 }
 0x2ea   :  { %1376 = vmatprep.subr.bf16.mxu1 %v1590_v0 }
 0x2ed   :  { %1378 = vmatpush3.bf16.msra.mxu1 %v1657_v7 }
 0x2ee   :  { %1385 = vmatprep.subr.bf16.mxu1 %v1590_v0 }
 0x3bb   :  { %v232_v33 = vpop.f32.mrb[0].mxu1 }
 0x3bc   :  { %v233_v34 = vadd.f32 %v232_v33, %v1676_v10  ;;  %v1266_v35 = vpop.f32.mrb[1].mxu1 }
 0x3be   :  { %244 = vrot.lane.b32.xlu1 %v233_v34, %s1594_s15  ;;  %v236_v37 = vadd.f32 %v233_v34, %v163_v36 }
 0x3c0   :  { %v1178_v38 = vmul.f32 -1.442695, %v236_v37 }
 0x3c2   :  { %1436 = vpow2.f32 %v1178_v38 }
 0x3cc   :  { %v1437_v39 = vpop.eup %1436 }
 0x3cd   :  { %v240_v40 = vadd.f32 1.0, %v1437_v39 }
 0x3cf   :  { %1438 = vrcp.f32 %v240_v40 }
 0x3d9   :  { %v1439_v41 = vpop.eup %1438 }
 0x3da   :  { %v254_v47 = vsub.f32 1.0, %v1439_v41  ;;  %v260_v49 = vmul.f32 %v1439_v41, %v157_v31 }
 0x430   :  { %v245_v42 = vpop.permute.xlu1 %244 }
 0x431   :  { %v247_v43 = vmul.f32 %v1439_v41, %v245_v42 }
 0x433   :  { %249 = vrot.lane.b32.xlu0 %v247_v43, %s1594_s15 }
 0x4a5   :  { %v250_v44 = vpop.permute.xlu0 %249 }
 0x4a6   :  { %v252_v45 = vadd.f32 %v250_v44, %v163_v36  ;;  %v489_v44 = vld [vmem:[#allocation2 + $0x20] sm:$0xff] }
 0x4a8   :  { %1440 = vtanh.f32 %v252_v45 }
 0x4b2   :  { %v1441_v46 = vpop.eup %1440 }
 0x4b3   :  { %256 = vrot.lane.b32.xlu1 %v1441_v46, %s1595_s1 }
 0x525   :  { %v257_v48 = vpop.permute.xlu1 %256 }
 0x526   :  { %v259_v50 = vmul.f32 %v257_v48, %v254_v47 }
 0x528   :  { %v261_v51 = vadd.f32 %v260_v49, %v259_v50 }
 0x52a   :  { %v263_v52 = vsel %vm262_vm4, %v261_v51, %v157_v31  ;;  %v264_v53 = vsel %vm262_vm4, %v261_v51, 0.0 }
 0x52b   :  { %269 = vrot.lane.b32.xlu0 %v263_v52, %s1595_s1  ;;  %266 = vst.msk [vmem:[#allocation7] sm:$0xff] %vm265_vm3, %v264_v53 }
 0x59d   :  { %v270_v54 = vpop.permute.xlu0 %269 }
 0x59e   :  { %1276 = vmatmul.mubr.msk.f32.vlgmr.msra.gmra.mrb[2].mxu0 %vm56_vm2, %v270_v54 }
 0x59f   :  { %1381 = vmatpush3.bf16.msra.mxu0 %v1654_v5  ;;  %1297 = vmatprep.mubr.msk.f32.mxu0 %vm1591_vm0, %v1592_v1 }
 0x5a0   :  { %1382 = vmatprep.subr.bf16.mxu0 %v1590_v0 }
 0x5a3   :  { %1384 = vmatpush3.bf16.msra.mxu0 %v1657_v7 }
 0x5a4   :  { %1391 = vmatprep.subr.bf16.mxu0 %v1590_v0 }
 0x671   :  { %v339_v55 = vpop.f32.mrb[2].mxu0 }
 0x672   :  { %v340_v56 = vadd.f32 %v339_v55, %v1676_v10  ;;  %v1277_v57 = vpop.f32.mrb[3].mxu0 }
 0x674   :  { %351 = vrot.lane.b32.xlu1 %v340_v56, %s1594_s15  ;;  %v343_v59 = vadd.f32 %v340_v56, %v267_v58 }
 0x676   :  { %v1180_v60 = vmul.f32 -1.442695, %v343_v59 }
 0x678   :  { %1442 = vpow2.f32 %v1180_v60 }
 0x682   :  { %v1443_v61 = vpop.eup %1442 }
 0x683   :  { %v347_v62 = vadd.f32 1.0, %v1443_v61 }
 0x685   :  { %1444 = vrcp.f32 %v347_v62 }
 0x68f   :  { %v1445_v63 = vpop.eup %1444 }
 0x690   :  { %v361_v9 = vsub.f32 1.0, %v1445_v63  ;;  %v367_v12 = vmul.f32 %v1445_v63, %v263_v52 }
 0x6e6   :  { %v352_v2 = vpop.permute.xlu1 %351 }
 0x6e7   :  { %v354_v3 = vmul.f32 %v1445_v63, %v352_v2 }
 0x6e9   :  { %356 = vrot.lane.b32.xlu0 %v354_v3, %s1594_s15 }
 0x75b   :  { %v357_v4 = vpop.permute.xlu0 %356 }
 0x75c   :  { %v359_v6 = vadd.f32 %v357_v4, %v267_v58  ;;  %v599_v4 = vld [vmem:[#allocation2 + $0x28] sm:$0xff] }
 0x75e   :  { %1446 = vtanh.f32 %v359_v6 }
 0x768   :  { %v1447_v8 = vpop.eup %1446 }
 0x769   :  { %363 = vrot.lane.b32.xlu1 %v1447_v8, %s1595_s1 }
 0x7db   :  { %v364_v11 = vpop.permute.xlu1 %363 }
 0x7dc   :  { %v366_v13 = vmul.f32 %v364_v11, %v361_v9 }
 0x7de   :  { %v368_v14 = vadd.f32 %v367_v12, %v366_v13 }
 0x7e0   :  { %v370_v15 = vsel %vm369_vm5, %v368_v14, %v263_v52  ;;  %v1713_v16 = vsel %vm369_vm5, %v368_v14, 0.0 }
 0x7e1   :  { %380 = vrot.lane.b32.xlu0 %v370_v15, %s1595_s1 }
 0x853   :  { %v381_v17 = vpop.permute.xlu0 %380 }
 0x854   :  { %1287 = vmatmul.mubr.msk.f32.vlgmr.msra.gmra.mrb[2].mxu1 %vm56_vm2, %v381_v17 }
 0x855   :  { %1387 = vmatpush3.bf16.msra.mxu1 %v1654_v5  ;;  %1308 = vmatprep.mubr.msk.f32.mxu1 %vm1591_vm0, %v1592_v1 }
 0x856   :  { %1388 = vmatprep.subr.bf16.mxu1 %v1590_v0 }
 0x859   :  { %1390 = vmatpush3.bf16.msra.mxu1 %v1657_v7 }
 0x85a   :  { %1397 = vmatprep.subr.bf16.mxu1 %v1590_v0 }
 0x927   :  { %v450_v18 = vpop.f32.mrb[2].mxu1 }
 0x928   :  { %v451_v19 = vadd.f32 %v450_v18, %v1676_v10  ;;  %v1288_v20 = vpop.f32.mrb[3].mxu1 }
 0x92a   :  { %462 = vrot.lane.b32.xlu1 %v451_v19, %s1594_s15  ;;  %v454_v22 = vadd.f32 %v451_v19, %v378_v21 }
 0x92c   :  { %v1182_v23 = vmul.f32 -1.442695, %v454_v22 }
 0x92e   :  { %1448 = vpow2.f32 %v1182_v23 }
 0x938   :  { %v1449_v24 = vpop.eup %1448 }
 0x939   :  { %v458_v26 = vadd.f32 1.0, %v1449_v24 }
 0x93b   :  { %1450 = vrcp.f32 %v458_v26 }
 0x945   :  { %v1451_v27 = vpop.eup %1450 }
 0x946   :  { %v472_v33 = vsub.f32 1.0, %v1451_v27  ;;  %v478_v35 = vmul.f32 %v1451_v27, %v370_v15 }
 0x99c   :  { %v463_v28 = vpop.permute.xlu1 %462 }
 0x99d   :  { %v465_v29 = vmul.f32 %v1451_v27, %v463_v28 }
 0x99f   :  { %467 = vrot.lane.b32.xlu0 %v465_v29, %s1594_s15 }
 0xa11   :  { %v468_v30 = vpop.permute.xlu0 %467 }
 0xa12   :  { %v470_v31 = vadd.f32 %v468_v30, %v378_v21 }
 0xa14   :  { %1452 = vtanh.f32 %v470_v31  ;;  %v705_v31 = vld [vmem:[#allocation2 + $0x30] sm:$0xff] }
 0xa1e   :  { %v1453_v32 = vpop.eup %1452 }
 0xa1f   :  { %474 = vrot.lane.b32.xlu1 %v1453_v32, %s1595_s1 }
 0xa91   :  { %v475_v34 = vpop.permute.xlu1 %474 }
 0xa92   :  { %v477_v36 = vmul.f32 %v475_v34, %v472_v33 }
 0xa94   :  { %v479_v37 = vadd.f32 %v478_v35, %v477_v36 }
 0xa96   :  { %v481_v38 = vsel %vm480_vm6, %v479_v37, %v370_v15  ;;  %v1728_v39 = vsel %vm480_vm6, %v479_v37, 0.0 }
 0xa97   :  { %491 = vrot.lane.b32.xlu0 %v481_v38, %s1595_s1 }
 0xb09   :  { %v492_v40 = vpop.permute.xlu0 %491 }
 0xb0a   :  { %1298 = vmatmul.mubr.msk.f32.vlgmr.msra.gmra.mrb[4].mxu0 %vm56_vm2, %v492_v40 }
 0xb0b   :  { %1393 = vmatpush3.bf16.msra.mxu0 %v1654_v5  ;;  %1319 = vmatprep.mubr.msk.f32.mxu0 %vm1591_vm0, %v1592_v1 }
 0xb0c   :  { %1394 = vmatprep.subr.bf16.mxu0 %v1590_v0 }
 0xb0f   :  { %1396 = vmatpush3.bf16.msra.mxu0 %v1657_v7 }
 0xb10   :  { %1403 = vmatprep.subr.bf16.mxu0 %v1590_v0 }
 0xbdd   :  { %v561_v41 = vpop.f32.mrb[4].mxu0 }
 0xbde   :  { %v562_v42 = vadd.f32 %v561_v41, %v1676_v10  ;;  %v1299_v43 = vpop.f32.mrb[5].mxu0 }
 0xbe0   :  { %573 = vrot.lane.b32.xlu1 %v562_v42, %s1594_s15  ;;  %v565_v45 = vadd.f32 %v562_v42, %v489_v44 }
 0xbe2   :  { %v1184_v46 = vmul.f32 -1.442695, %v565_v45 }
 0xbe4   :  { %1454 = vpow2.f32 %v1184_v46 }
 0xbee   :  { %v1455_v47 = vpop.eup %1454 }
 0xbef   :  { %v569_v48 = vadd.f32 1.0, %v1455_v47 }
 0xbf1   :  { %1456 = vrcp.f32 %v569_v48 }
 0xbfb   :  { %v1457_v49 = vpop.eup %1456 }
 0xbfc   :  { %v583_v55 = vsub.f32 1.0, %v1457_v49  ;;  %v589_v57 = vmul.f32 %v1457_v49, %v481_v38 }
 0xc52   :  { %v574_v50 = vpop.permute.xlu1 %573 }
 0xc53   :  { %v576_v51 = vmul.f32 %v1457_v49, %v574_v50 }
 0xc55   :  { %578 = vrot.lane.b32.xlu0 %v576_v51, %s1594_s15 }
 0xcc7   :  { %v579_v52 = vpop.permute.xlu0 %578 }
 0xcc8   :  { %v581_v53 = vadd.f32 %v579_v52, %v489_v44 }
 0xcca   :  { %1458 = vtanh.f32 %v581_v53 }
 0xcd4   :  { %v1459_v54 = vpop.eup %1458 }
 0xcd5   :  { %585 = vrot.lane.b32.xlu1 %v1459_v54, %s1595_s1  ;;  %v815_v54 = vld [vmem:[#allocation2 + $0x38] sm:$0xff] }
 0xd47   :  { %v586_v56 = vpop.permute.xlu1 %585 }
 0xd48   :  { %v588_v58 = vmul.f32 %v586_v56, %v583_v55 }
 0xd4a   :  { %v590_v59 = vadd.f32 %v589_v57, %v588_v58 }
 0xd4c   :  { %v592_v60 = vsel %vm591_vm7, %v590_v59, %v481_v38  ;;  %v1743_v61 = vsel %vm591_vm7, %v590_v59, 0.0 }
 0xd4d   :  { %601 = vrot.lane.b32.xlu0 %v592_v60, %s1595_s1 }
 0xdbf   :  { %v602_v62 = vpop.permute.xlu0 %601 }
 0xdc0   :  { %1309 = vmatmul.mubr.msk.f32.vlgmr.msra.gmra.mrb[4].mxu1 %vm56_vm2, %v602_v62 }
 0xdc1   :  { %1399 = vmatpush3.bf16.msra.mxu1 %v1654_v5  ;;  %1330 = vmatprep.mubr.msk.f32.mxu1 %vm1591_vm0, %v1592_v1 }
 0xdc2   :  { %1400 = vmatprep.subr.bf16.mxu1 %v1590_v0 }
 0xdc5   :  { %1402 = vmatpush3.bf16.msra.mxu1 %v1657_v7 }
 0xdc6   :  { %1409 = vmatprep.subr.bf16.mxu1 %v1590_v0 }
 0xe93   :  { %v671_v63 = vpop.f32.mrb[4].mxu1 }
 0xe94   :  { %v672_v2 = vadd.f32 %v671_v63, %v1676_v10  ;;  %v1310_v3 = vpop.f32.mrb[5].mxu1 }
 0xe96   :  { %683 = vrot.lane.b32.xlu1 %v672_v2, %s1594_s15  ;;  %v675_v6 = vadd.f32 %v672_v2, %v599_v4 }
 0xe98   :  { %v1186_v8 = vmul.f32 -1.442695, %v675_v6 }
 0xe9a   :  { %1460 = vpow2.f32 %v1186_v8 }
 0xea4   :  { %v1461_v9 = vpop.eup %1460 }
 0xea5   :  { %v679_v11 = vadd.f32 1.0, %v1461_v9 }
 0xea7   :  { %1462 = vrcp.f32 %v679_v11 }
 0xeb1   :  { %v1463_v12 = vpop.eup %1462 }
 0xeb2   :  { %v693_v19 = vsub.f32 1.0, %v1463_v12  ;;  %v699_v21 = vmul.f32 %v1463_v12, %v592_v60 }
 0xf08   :  { %v684_v13 = vpop.permute.xlu1 %683 }
 0xf09   :  { %v686_v14 = vmul.f32 %v1463_v12, %v684_v13 }
 0xf0b   :  { %688 = vrot.lane.b32.xlu0 %v686_v14, %s1594_s15  ;;  %v925_v14 = vld [vmem:[#allocation2 + $0x40] sm:$0xff] }
 0xf7d   :  { %v689_v15 = vpop.permute.xlu0 %688 }
 0xf7e   :  { %v691_v17 = vadd.f32 %v689_v15, %v599_v4 }
 0xf80   :  { %1464 = vtanh.f32 %v691_v17 }
 0xf8a   :  { %v1465_v18 = vpop.eup %1464 }
 0xf8b   :  { %695 = vrot.lane.b32.xlu1 %v1465_v18, %s1595_s1 }
 0xffd   :  { %v696_v20 = vpop.permute.xlu1 %695 }
 0xffe   :  { %v698_v22 = vmul.f32 %v696_v20, %v693_v19 }
0x1000   :  { %v700_v23 = vadd.f32 %v699_v21, %v698_v22 }
0x1002   :  { %v702_v24 = vsel %vm701_vm8, %v700_v23, %v592_v60  ;;  %v1758_v26 = vsel %vm701_vm8, %v700_v23, 0.0 }
0x1003   :  { %707 = vrot.lane.b32.xlu0 %v702_v24, %s1595_s1 }
0x1075   :  { %v708_v27 = vpop.permute.xlu0 %707 }
0x1076   :  { %1320 = vmatmul.mubr.msk.f32.vlgmr.msra.gmra.mrb[6].mxu0 %vm56_vm2, %v708_v27 }
0x1077   :  { %1405 = vmatpush3.bf16.msra.mxu0 %v1654_v5  ;;  %1341 = vmatprep.mubr.msk.f32.mxu0 %vm1591_vm0, %v1592_v1 }
0x1078   :  { %1406 = vmatprep.subr.bf16.mxu0 %v1590_v0 }
0x107b   :  { %1408 = vmatpush3.bf16.msra.mxu0 %v1657_v7 }
0x1149   :  { %v777_v28 = vpop.f32.mrb[6].mxu0 }
0x114a   :  { %v778_v29 = vadd.f32 %v777_v28, %v1676_v10  ;;  %v1321_v30 = vpop.f32.mrb[7].mxu0 }
0x114c   :  { %789 = vrot.lane.b32.xlu1 %v778_v29, %s1594_s15  ;;  %v781_v32 = vadd.f32 %v778_v29, %v705_v31 }
0x114e   :  { %v1188_v33 = vmul.f32 -1.442695, %v781_v32 }
0x1150   :  { %1466 = vpow2.f32 %v1188_v33 }
0x115a   :  { %v1467_v34 = vpop.eup %1466 }
0x115b   :  { %v785_v35 = vadd.f32 1.0, %v1467_v34 }
0x115d   :  { %1468 = vrcp.f32 %v785_v35 }
0x1167   :  { %v1469_v36 = vpop.eup %1468 }
0x1168   :  { %v799_v43 = vsub.f32 1.0, %v1469_v36  ;;  %v805_v45 = vmul.f32 %v1469_v36, %v702_v24 }
0x11be   :  { %v790_v37 = vpop.permute.xlu1 %789 }
0x11bf   :  { %v792_v38 = vmul.f32 %v1469_v36, %v790_v37 }
0x11c1   :  { %794 = vrot.lane.b32.xlu0 %v792_v38, %s1594_s15 }
0x1233   :  { %v795_v40 = vpop.permute.xlu0 %794 }
0x1234   :  { %v797_v41 = vadd.f32 %v795_v40, %v705_v31  ;;  %v1035_v40 = vld [vmem:[#allocation2 + $0x48] sm:$0xff] }
0x1236   :  { %1470 = vtanh.f32 %v797_v41 }
0x1240   :  { %v1471_v42 = vpop.eup %1470 }
0x1241   :  { %801 = vrot.lane.b32.xlu1 %v1471_v42, %s1595_s1 }
0x12b3   :  { %v802_v44 = vpop.permute.xlu1 %801 }
0x12b4   :  { %v804_v46 = vmul.f32 %v802_v44, %v799_v43 }
0x12b6   :  { %v806_v47 = vadd.f32 %v805_v45, %v804_v46 }
0x12b8   :  { %v808_v48 = vsel %vm807_vm9, %v806_v47, %v702_v24  ;;  %v1772_v49 = vsel %vm807_vm9, %v806_v47, 0.0 }
0x12b9   :  { %817 = vrot.lane.b32.xlu0 %v808_v48, %s1595_s1 }
0x132b   :  { %v818_v50 = vpop.permute.xlu0 %817 }
0x132c   :  { %1331 = vmatmul.mubr.msk.f32.vlgmr.msra.gmra.mrb[6].mxu1 %vm56_vm2, %v818_v50 }
0x132d   :  { %1411 = vmatpush3.bf16.msra.mxu1 %v1654_v5  ;;  %1352 = vmatprep.mubr.msk.f32.mxu1 %vm1591_vm0, %v1592_v1 }
0x132e   :  { %1412 = vmatprep.subr.bf16.mxu1 %v1590_v0 }
0x1331   :  { %1414 = vmatpush3.bf16.msra.mxu1 %v1657_v7 }
0x13ff   :  { %v887_v51 = vpop.f32.mrb[6].mxu1 }
0x1400   :  { %v888_v52 = vadd.f32 %v887_v51, %v1676_v10  ;;  %v1332_v53 = vpop.f32.mrb[7].mxu1 }
0x1402   :  { %899 = vrot.lane.b32.xlu1 %v888_v52, %s1594_s15  ;;  %v891_v55 = vadd.f32 %v888_v52, %v815_v54 }
0x1404   :  { %v1190_v56 = vmul.f32 -1.442695, %v891_v55 }
0x1406   :  { %1472 = vpow2.f32 %v1190_v56 }
0x1410   :  { %v1473_v57 = vpop.eup %1472 }
0x1411   :  { %v895_v58 = vadd.f32 1.0, %v1473_v57 }
0x1413   :  { %1474 = vrcp.f32 %v895_v58 }
0x141d   :  { %v1475_v5 = vpop.eup %1474 }
0x141e   :  { %v909_v62 = vsub.f32 1.0, %v1475_v5  ;;  %v915_v2 = vmul.f32 %v1475_v5, %v808_v48 }
0x1474   :  { %v900_v59 = vpop.permute.xlu1 %899 }
0x1475   :  { %v902_v1 = vmul.f32 %v1475_v5, %v900_v59 }
0x1477   :  { %904 = vrot.lane.b32.xlu0 %v902_v1, %s1594_s15 }
0x14e9   :  { %v905_v0 = vpop.permute.xlu0 %904 }
0x14ea   :  { %v907_v7 = vadd.f32 %v905_v0, %v815_v54 }
0x14ec   :  { %1476 = vtanh.f32 %v907_v7 }
0x14f6   :  { %v1477_v60 = vpop.eup %1476 }
0x14f7   :  { %911 = vrot.lane.b32.xlu1 %v1477_v60, %s1595_s1 }
0x1569   :  { %v912_v63 = vpop.permute.xlu1 %911 }
0x156a   :  { %v914_v3 = vmul.f32 %v912_v63, %v909_v62 }
0x156c   :  { %v916_v4 = vadd.f32 %v915_v2, %v914_v3 }
0x156e   :  { %v918_v6 = vsel %vm917_vm10, %v916_v4, %v808_v48  ;;  %v1786_v8 = vsel %vm917_vm10, %v916_v4, 0.0 }
0x156f   :  { %927 = vrot.lane.b32.xlu0 %v918_v6, %s1595_s1 }
0x15e1   :  { %v928_v9 = vpop.permute.xlu0 %927 }
0x15e2   :  { %1342 = vmatmul.mubr.msk.f32.vlgmr.msra.gmra.mrb[8].mxu0 %vm56_vm2, %v928_v9 }
0x16b5   :  { %v997_v11 = vpop.f32.mrb[8].mxu0 }
0x16b6   :  { %v998_v12 = vadd.f32 %v997_v11, %v1676_v10  ;;  %v1343_v13 = vpop.f32.mrb[9].mxu0 }
0x16b8   :  { %1009 = vrot.lane.b32.xlu1 %v998_v12, %s1594_s15  ;;  %v1001_v15 = vadd.f32 %v998_v12, %v925_v14 }
0x16ba   :  { %v1192_v17 = vmul.f32 -1.442695, %v1001_v15 }
0x16bc   :  { %1478 = vpow2.f32 %v1192_v17 }
0x16c6   :  { %v1479_v18 = vpop.eup %1478 }
0x16c7   :  { %v1005_v19 = vadd.f32 1.0, %v1479_v18 }
0x16c9   :  { %1480 = vrcp.f32 %v1005_v19 }
0x16d3   :  { %v1481_v20 = vpop.eup %1480 }
0x16d4   :  { %v1019_v28 = vsub.f32 1.0, %v1481_v20  ;;  %v1025_v30 = vmul.f32 %v1481_v20, %v918_v6 }
0x172a   :  { %v1010_v21 = vpop.permute.xlu1 %1009 }
0x172b   :  { %v1012_v22 = vmul.f32 %v1481_v20, %v1010_v21 }
0x172d   :  { %1014 = vrot.lane.b32.xlu0 %v1012_v22, %s1594_s15 }
0x179f   :  { %v1015_v23 = vpop.permute.xlu0 %1014 }
0x17a0   :  { %v1017_v24 = vadd.f32 %v1015_v23, %v925_v14 }
0x17a2   :  { %1482 = vtanh.f32 %v1017_v24 }
0x17ac   :  { %v1483_v27 = vpop.eup %1482 }
0x17ad   :  { %1021 = vrot.lane.b32.xlu1 %v1483_v27, %s1595_s1 }
0x181f   :  { %v1022_v29 = vpop.permute.xlu1 %1021 }
0x1820   :  { %v1024_v31 = vmul.f32 %v1022_v29, %v1019_v28 }
0x1822   :  { %v1026_v32 = vadd.f32 %v1025_v30, %v1024_v31 }
0x1824   :  { %v1028_v33 = vsel %vm1027_vm11, %v1026_v32, %v918_v6  ;;  %v1029_v34 = vsel %vm1027_vm11, %v1026_v32, 0.0 }
0x1825   :  { %1037 = vrot.lane.b32.xlu0 %v1028_v33, %s1595_s1 }
0x1897   :  { %v1038_v35 = vpop.permute.xlu0 %1037 }
0x1898   :  { %1353 = vmatmul.mubr.msk.f32.vlgmr.msra.gmra.mrb[8].mxu1 %vm56_vm2, %v1038_v35 }
0x196b   :  { %v1107_v36 = vpop.f32.mrb[8].mxu1 }
0x196c   :  { %v1108_v37 = vadd.f32 %v1107_v36, %v1676_v10  ;;  %v1354_v38 = vpop.f32.mrb[9].mxu1 }
0x196e   :  { %1119 = vrot.lane.b32.xlu1 %v1108_v37, %s1594_s15  ;;  %v1111_v41 = vadd.f32 %v1108_v37, %v1035_v40 }
0x1970   :  { %v1194_v42 = vmul.f32 -1.442695, %v1111_v41 }
0x1972   :  { %1484 = vpow2.f32 %v1194_v42 }
0x197c   :  { %v1485_v43 = vpop.eup %1484 }
0x197d   :  { %v1115_v44 = vadd.f32 1.0, %v1485_v43 }
0x197f   :  { %1486 = vrcp.f32 %v1115_v44 }
0x1989   :  { %v1487_v45 = vpop.eup %1486 }
0x198a   :  { %v1135_v52 = vmul.f32 %v1487_v45, %v1028_v33 }
0x19e0   :  { %v1120_v46 = vpop.permute.xlu1 %1119 }
0x19e1   :  { %v1122_v47 = vmul.f32 %v1487_v45, %v1120_v46 }
0x19e3   :  { %1124 = vrot.lane.b32.xlu0 %v1122_v47, %s1594_s15 }
0x19e7   :  { %595 = vrot.lane.b32.xlu0 %v1743_v61, %s1595_s1 }
0x19eb   :  { %811 = vrot.lane.b32.xlu0 %v1772_v49, %s1596_s16 }
0x19ef   :  { %484 = vrot.lane.b32.xlu0 %v1728_v39, %s1594_s15  ;;  %v1129_v39 = vsub.f32 1.0, %v1487_v45 }
0x1a55   :  { %v1125_v10 = vpop.permute.xlu0 %1124 }
0x1a56   :  { %v1127_v48 = vadd.f32 %v1125_v10, %v1035_v40 }
0x1a58   :  { %1488 = vtanh.f32 %v1127_v48 }
0x1a59   :  { %v596_v50 = vpop.permute.xlu0 %595 }
0x1a5a   :  { %598 = vst.msk [vmem:[#allocation7 + $0x8] sm:$0xff] %vm56_vm2, %v596_v50 }
0x1a5b   :  { %704 = vst.msk [vmem:[#allocation7 + $0x8] sm:$0xff] %vm265_vm3, %v1758_v26 }
0x1a5d   :  { %v812_v51 = vpop.permute.xlu0 %811 }
0x1a5e   :  { %814 = vst.msk [vmem:[#allocation7 + $0x8] sm:$0xff] %vm376_vm12, %v812_v51 }
0x1a61   :  { %v485_v55 = vpop.permute.xlu0 %484 }
0x1a62   :  { %v1489_v61 = vpop.eup %1488 }
0x1a63   :  { %1131 = vrot.lane.b32.xlu1 %v1489_v61, %s1595_s1 }
0x1a67   :  { %373 = vrot.lane.b32.xlu1 %v1713_v16, %s1596_s16 }
0x1a6b   :  { %1031 = vrot.lane.b32.xlu1 %v1029_v34, %s1595_s1 }
0x1a6f   :  { %921 = vrot.lane.b32.xlu1 %v1786_v8, %s1594_s15 }
0x1ad5   :  { %v1132_v49 = vpop.permute.xlu1 %1131 }
0x1ad6   :  { %v1134_v53 = vmul.f32 %v1132_v49, %v1129_v39 }
0x1ad8   :  { %v1136_v54 = vadd.f32 %v1135_v52, %v1134_v53 }
0x1ad9   :  { %v374_v26 = vpop.permute.xlu1 %373 }
0x1ada   :  { %377 = vst.msk [vmem:[#allocation7] sm:$0xff] %vm376_vm12, %v374_v26  ;;  %v1138_v56 = vsel %vm1137_vm14, %v1136_v54, %v1028_v33  ;;  %v1139_v57 = vsel %vm1137_vm14, %v1136_v54, 0.0 }
0x1adb   :  { %1142 = vrot.lane.b32.xlu0 %v1138_v56, %s1595_s1  ;;  %488 = vst.msk [vmem:[#allocation7] sm:$0xff] %vm487_vm13, %v485_v55 }
0x1add   :  { %v1032_v16 = vpop.permute.xlu1 %1031 }
0x1ade   :  { %1034 = vst.msk [vmem:[#allocation7 + $0x10] sm:$0xff] %vm56_vm2, %v1032_v16 }
0x1adf   :  { %1140 = vst.msk [vmem:[#allocation7 + $0x10] sm:$0xff] %vm265_vm3, %v1139_v57 }
0x1ae1   :  { %v922_v58 = vpop.permute.xlu1 %921 }
0x1ae2   :  { %924 = vst.msk [vmem:[#allocation7 + $0x8] sm:$0xff] %vm487_vm13, %v922_v58 }
0x1ae3   :  { %1545 = shalt.err (!%p1542_p6)
}
0x1ae4   :  { %s1546_s22 = scalar_lea.hbm %s1849_s3, 384 }
0x1ae5   :  { %p1547_p7 = scmp.ne.s32.totalorder %s1849_s3, %s1546_s22  ;;  %p1550_p8 = scmp.lt.u32.totalorder %s1546_s22, %s1849_s3 }
0x1ae7   :  { %p1552_p9 = pnand %p1550_p8, %p1547_p7 }
0x1ae9   :  { %1555 = shalt.err (!%p1552_p9)
}
0x1aea   :  { %1155 = dma.vmem_to_hbm [thread:$0]  %s1153_s18, 384, %s1849_s3, [#allocation4]  }
0x1aeb   :  { %s1598_s29 = smov [#allocation8]  }
0x1aec   :  { %s1162_s30 = sshll.u32 %s1598_s29, 4  ;;  %s1163_s30 = int_to_ptr.vmem [resolvable:$true] %s1162_s30 }
0x1aed   :  { %s1556_s5 = scalar_lea.vmem %s1163_s30, 128  ;;  %p1561_p11 = scmp.lt.s32.totalorder %s1163_s30, %s1163_s30 }
0x1aee   :  { %p1557_p10 = scmp.ne.s32.totalorder %s1163_s30, %s1556_s5  ;;  %p1562_p12 = scmp.lt.s32.totalorder %s1556_s5, %s1556_s5 }
0x1af0   :  { %p1563_p13 = por %p1562_p12, %p1561_p11 }
0x1af2   :  { %p1564_p0 = pnand %p1563_p13, %p1557_p10 }
0x1b4d   :  { %v1143_v25 = vpop.permute.xlu0 %1142 }
0x1b4e   :  { %1145 = vst.msk [vmem:[#allocation8] sm:$0xff] %vm56_vm2, %v1143_v25 }
0x1b4f   :  { %1567 = shalt.err (!%p1564_p0)
}
0x1b50   :  { %s1568_s8 = scalar_lea.hbm %s1850_s4, 128 }
0x1b51   :  { %p1569_p1 = scmp.ne.s32.totalorder %s1850_s4, %s1568_s8  ;;  %p1572_p2 = scmp.lt.u32.totalorder %s1568_s8, %s1850_s4 }
0x1b53   :  { %p1574_p3 = pnand %p1572_p2, %p1569_p1 }
0x1b55   :  { %1577 = shalt.err (!%p1574_p3)
}
0x1b56   :  { %1165 = dma.vmem_to_hbm [thread:$0]  %s1163_s30, 128, %s1850_s4, [#allocation9]  }
0x1b57   :  { %1582 = dma.done.wait [#allocation4], 384  }
0x1b58   :  { %1583 = vsyncadd [#allocation4], 4294966912 }
0x1b59   :  { %1584 = dma.done.wait [#allocation9], 128  }
0x1b5a   :  { %1585 = vsyncadd [#allocation9], 4294967168 }
0x1b5b   :  { %1172 = vsyncpa [#allocation3], 1 }
0x1b5c   :  { %1173 = vsyncpa [#allocation6], 1 }
0x1b5d   :  { %1174 = vsyncpa [#allocation4], 1 }
0x1b5e   :  { %1175 = vsyncpa [#allocation9], 1 }

</bundles_post_ra>
